<compile_context>
chip_gen: v7x
topology: tpu7x:2x2x1
jax: 0.10.0
libtpu: 0.0.40
codegen_flags: <defaults>
</compile_context>

<pallas_src>
import functools

import jax
import jax.numpy as jnp
from jax.experimental import pallas as pl
from jax.experimental.pallas import tpu as pltpu

_HIGHEST = jax.lax.Precision.HIGHEST


def _attention_kernel(Tq, Tk, lens_ref,              # static dims, SMEM lengths
                      q_ref, k_ref, wq_ref, bq_ref,  # VMEM inputs
                      ctx_ref, probs_ref):           # VMEM outputs
    BTq, _ = q_ref.shape        # (B*Tq, Nq)  batch-major query rows
    BTk, _ = k_ref.shape        # (B*Tk, Nk)  batch-major key rows
    B = BTk // Tk

    # linear_q for all B*Tq query rows in one MXU matmul (scale is pre-folded
    # into wq/bq on the wrapper side).
    att_q = jnp.dot(q_ref[...], wq_ref[...], precision=_HIGHEST,
                    preferred_element_type=jnp.float32) + bq_ref[...]

    # Scores against ALL batch-concatenated keys in a single 2-D matmul.
    # Cross-batch blocks are removed by the mask below.
    k = k_ref[...]
    scores = jnp.dot(att_q, k.T, precision=_HIGHEST,
                     preferred_element_type=jnp.float32)          # (B*Tq, B*Tk)

    # Validity mask: (query row i, key column j) is valid iff both belong to
    # the same batch b AND the key position is < output_lengths[b].
    row_idx = jax.lax.broadcasted_iota(jnp.int32, scores.shape, 0)
    col_idx = jax.lax.broadcasted_iota(jnp.int32, scores.shape, 1)
    valid = None
    for b in range(B):                      # B is tiny & static (trace-time loop)
        col_end = b * Tk + jnp.minimum(lens_ref[b], Tk)           # SMEM scalar
        row_ok = (row_idx >= b * Tq) & (row_idx < (b + 1) * Tq)
        col_ok = (col_idx >= b * Tk) & (col_idx < col_end)
        term = row_ok & col_ok
        valid = term if valid is None else (valid | term)
    scores = jnp.where(valid, scores, -jnp.inf)

    # Softmax over the key axis; cross-batch / padded columns are -inf and
    # contribute exactly 0.  (NOTE: a zero-length sequence yields NaNs, same
    # as the PyTorch masked_fill + softmax behavior.)
    m = jnp.max(scores, axis=-1, keepdims=True)
    e = jnp.exp(scores - m)
    s = jnp.sum(e, axis=-1, keepdims=True)
    probs = e / s                                                  # (B*Tq, B*Tk)

    # context = probs @ values (values == keys).  Zero cross-batch probs make
    # the batch-concatenated contraction exactly block-diagonal.
    ctx = jnp.dot(probs, k, precision=_HIGHEST,
                  preferred_element_type=jnp.float32)              # (B*Tq, Nk)
    ctx_ref[...] = ctx.astype(ctx_ref.dtype)

    # Emit only the per-batch diagonal blocks of probs (the nonzero ones).
    for b in range(B):
        probs_ref[b * Tq:(b + 1) * Tq, :] = (
            probs[b * Tq:(b + 1) * Tq, b * Tk:(b + 1) * Tk].astype(probs_ref.dtype))


def attention_layer(query, keys, output_lengths, wq, bq, scale):
    """query: (B, Tq, Nq) f32; keys == values: (B, Tk, Nk) f32;
    output_lengths: (B,) int; wq: (Nk, Nq) nn.Linear weight layout; bq: (Nk,);
    scale: scalar.  Returns (context (B, Tq, Nk), probs (B, Tq, Tk))."""
    B, Tq, Nq = query.shape
    _, Tk, Nk = keys.shape

    # Wrapper-side layout plumbing (contiguous reshapes, free) + one-time
    # parameter prep: fold the learned scalar `scale` into the projection.
    q2 = query.reshape(B * Tq, Nq)
    k2 = keys.reshape(B * Tk, Nk)
    wqs = (wq * scale).T.astype(jnp.float32)              # (Nq, Nk)
    bqs = (bq * scale).reshape(1, Nk).astype(jnp.float32)
    lens = output_lengths.astype(jnp.int32)

    kernel = functools.partial(_attention_kernel, Tq, Tk)

    grid_spec = pltpu.PrefetchScalarGridSpec(
        num_scalar_prefetch=1,                             # output_lengths -> SMEM
        grid=(1,),                                         # single fused step
        in_specs=[
            pl.BlockSpec((B * Tq, Nq), lambda i, _: (0, 0)),   # query rows
            pl.BlockSpec((B * Tk, Nk), lambda i, _: (0, 0)),   # key rows
            pl.BlockSpec((Nq, Nk), lambda i, _: (0, 0)),       # scale * Wq^T
            pl.BlockSpec((1, Nk), lambda i, _: (0, 0)),        # scale * bq
        ],
        out_specs=[
            pl.BlockSpec((B * Tq, Nk), lambda i, _: (0, 0)),   # context
            pl.BlockSpec((B * Tq, Tk), lambda i, _: (0, 0)),   # probs
        ],
    )

    flops = 2 * (B * Tq) * Nq * Nk + 4 * (B * Tq) * (B * Tk) * Nk
    cost = pl.CostEstimate(
        flops=flops,
        transcendentals=(B * Tq) * (B * Tk),
        bytes_accessed=4 * (B * Tq * Nq + B * Tk * Nk + Nq * Nk + Nk
                            + B * Tq * Nk + B * Tq * Tk) + 4 * B,
    )

    ctx2, probs2 = pl.pallas_call(
        kernel,
        out_shape=(
            jax.ShapeDtypeStruct((B * Tq, Nk), jnp.float32),
            jax.ShapeDtypeStruct((B * Tq, Tk), jnp.float32),
        ),
        grid_spec=grid_spec,
        compiler_params=pltpu.CompilerParams(
            dimension_semantics=("arbitrary",)),
        cost_estimate=cost,
    )(lens, q2, k2, wqs, bqs)

    # Free, contiguous un-flattens back to the module's (B, Tq, *) layout.
    return ctx2.reshape(B, Tq, Nk), probs2.reshape(B, Tq, Tk)


def _reference(query, keys, output_lengths, wq, bq, scale):
    att_q = jnp.einsum("btn,kn->btk", query, wq, precision=_HIGHEST) + bq
    scores = jnp.einsum("bqn,bkn->bqk", att_q, keys, precision=_HIGHEST) * scale
    Tk = keys.shape[1]
    mask = jnp.arange(Tk)[None, None, :] < output_lengths[:, None, None]
    scores = jnp.where(mask, scores, -jnp.inf)
    probs = jax.nn.softmax(scores, axis=2)
    ctx = jnp.einsum("bqk,bkn->bqn", probs, keys, precision=_HIGHEST)
    return ctx, probs


if __name__ == "__main__":
    # hp.syl_embedding_dim = 32 (query size), hp.ref_enc_gru_size = 32 (key/value size)
    B, Tq, Tk, Nq, Nk = 2, 8, 16, 32, 32

    key = jax.random.PRNGKey(0)
    kq, kk, kw, kb = jax.random.split(key, 4)

    query = jax.random.normal(kq, (B, Tq, Nq), dtype=jnp.float32)
    keys = jax.random.normal(kk, (B, Tk, Nk), dtype=jnp.float32)
    output_lengths = jnp.array([Tk, 10], dtype=jnp.int32)

    # Deterministic parameters (shapes per nn.Linear(query_size, key_size)).
    wq = jax.random.normal(kw, (Nk, Nq), dtype=jnp.float32) * 0.1
    bq = jax.random.normal(kb, (Nk,), dtype=jnp.float32) * 0.1
    scale = jnp.float32(1.0)   # nn.Parameter(torch.Tensor([1]))

    ctx, probs = attention_layer(query, keys, output_lengths, wq, bq, scale)
    jax.block_until_ready((ctx, probs))

    ref_ctx, ref_probs = _reference(query, keys, output_lengths, wq, bq, scale)
    # With HIGHEST-precision matmuls on both sides the agreement is ~1e-5;
    # the tolerance leaves margin for MXU accumulation-order differences while
    # still catching any semantic error (mask / batch-block mistakes are O(0.1+)).
    assert jnp.allclose(ctx, ref_ctx, atol=5e-3, rtol=5e-3), "context mismatch"
    assert jnp.allclose(probs, ref_probs, atol=5e-3, rtol=5e-3), "probs mismatch"

    print("KERNEL_OK")
</pallas_src>

<mosaic_0001>
module attributes {stable_mosaic.version = 11 : i64} {
  func.func @_attention_kernel(%arg0: i32, %arg1: memref<2xi32, #tpu.memory_space<smem>>, %arg2: memref<16x32xf32, #tpu.memory_space<vmem>>, %arg3: memref<32x32xf32, #tpu.memory_space<vmem>>, %arg4: memref<32x32xf32, #tpu.memory_space<vmem>>, %arg5: memref<1x32xf32, #tpu.memory_space<vmem>>, %arg6: memref<16x32xf32, #tpu.memory_space<vmem>>, %arg7: memref<16x16xf32, #tpu.memory_space<vmem>>) attributes {dimension_semantics = [#tpu.dimension_semantics<arbitrary>], iteration_bounds = array<i64: 1>, scalar_prefetch = 1 : i64, scratch_operands = 0 : i64, tpu.core_type = #tpu.core_type<tc>, window_params = [{pipeline_mode = #tpu.pipeline_mode<synchronous>, transform_indices = @transform_0, window_bounds = array<i64: 16, 32>}, {pipeline_mode = #tpu.pipeline_mode<synchronous>, transform_indices = @transform_1, window_bounds = array<i64: 32, 32>}, {pipeline_mode = #tpu.pipeline_mode<synchronous>, transform_indices = @transform_2, window_bounds = array<i64: 32, 32>}, {pipeline_mode = #tpu.pipeline_mode<synchronous>, transform_indices = @transform_3, window_bounds = array<i64: 1, 32>}, {pipeline_mode = #tpu.pipeline_mode<synchronous>, transform_indices = @transform_4, window_bounds = array<i64: 16, 32>}, {pipeline_mode = #tpu.pipeline_mode<synchronous>, transform_indices = @transform_5, window_bounds = array<i64: 16, 16>}]} {
    %c0 = arith.constant 0 : index
    %c0_0 = arith.constant 0 : index
    %0 = vector.load %arg2[%c0, %c0_0] : memref<16x32xf32, #tpu.memory_space<vmem>>, vector<16x32xf32>
    %c0_1 = arith.constant 0 : index
    %c0_2 = arith.constant 0 : index
    %1 = vector.load %arg4[%c0_1, %c0_2] : memref<32x32xf32, #tpu.memory_space<vmem>>, vector<32x32xf32>
    %cst = arith.constant dense<0.000000e+00> : vector<16x32xf32>
    %2 = tpu.matmul %0, %1, %cst {dimension_numbers = #tpu.dot_dimension_numbers<[1], [0], [0], [1], [0, 0, 1, 1], [], []>, precision = #tpu.contract_precision<fp32>} : vector<16x32xf32>, vector<32x32xf32>, vector<16x32xf32> -> vector<16x32xf32>
    %c0_3 = arith.constant 0 : index
    %c0_4 = arith.constant 0 : index
    %3 = vector.load %arg5[%c0_3, %c0_4] : memref<1x32xf32, #tpu.memory_space<vmem>>, vector<1x32xf32>
    %4 = vector.broadcast %3 : vector<1x32xf32> to vector<16x32xf32>
    %5 = arith.addf %2, %4 : vector<16x32xf32>
    %c0_5 = arith.constant 0 : index
    %c0_6 = arith.constant 0 : index
    %6 = vector.load %arg3[%c0_5, %c0_6] : memref<32x32xf32, #tpu.memory_space<vmem>>, vector<32x32xf32>
    %7 = tpu.transpose %6, [1, 0] : vector<32x32xf32> -> vector<32x32xf32>
    %cst_7 = arith.constant dense<0.000000e+00> : vector<16x32xf32>
    %8 = tpu.matmul %5, %7, %cst_7 {dimension_numbers = #tpu.dot_dimension_numbers<[1], [0], [0], [1], [0, 0, 1, 1], [], []>, precision = #tpu.contract_precision<fp32>} : vector<16x32xf32>, vector<32x32xf32>, vector<16x32xf32> -> vector<16x32xf32>
    %9 = tpu.iota {dimensions = array<i32: 0>} : vector<16x32xi32>
    %10 = tpu.iota {dimensions = array<i32: 1>} : vector<16x32xi32>
    %c0_8 = arith.constant 0 : index
    %11 = memref.load %arg1[%c0_8] : memref<2xi32, #tpu.memory_space<smem>>
    %c16_i32 = arith.constant 16 : i32
    %12 = arith.minsi %11, %c16_i32 : i32
    %c0_i32 = arith.constant 0 : i32
    %13 = arith.addi %c0_i32, %12 : i32
    %c0_i32_9 = arith.constant 0 : i32
    %14 = vector.broadcast %c0_i32_9 : i32 to vector<16x32xi32>
    %15 = arith.cmpi sge, %9, %14 : vector<16x32xi32>
    %c8_i32 = arith.constant 8 : i32
    %16 = vector.broadcast %c8_i32 : i32 to vector<16x32xi32>
    %17 = arith.cmpi slt, %9, %16 : vector<16x32xi32>
    %18 = arith.andi %15, %17 : vector<16x32xi1>
    %c0_i32_10 = arith.constant 0 : i32
    %19 = vector.broadcast %c0_i32_10 : i32 to vector<16x32xi32>
    %20 = arith.cmpi sge, %10, %19 : vector<16x32xi32>
    %21 = vector.broadcast %13 : i32 to vector<16x32xi32>
    %22 = arith.cmpi slt, %10, %21 : vector<16x32xi32>
    %23 = arith.andi %20, %22 : vector<16x32xi1>
    %24 = arith.andi %18, %23 : vector<16x32xi1>
    %c1 = arith.constant 1 : index
    %25 = memref.load %arg1[%c1] : memref<2xi32, #tpu.memory_space<smem>>
    %c16_i32_11 = arith.constant 16 : i32
    %26 = arith.minsi %25, %c16_i32_11 : i32
    %c16_i32_12 = arith.constant 16 : i32
    %27 = arith.addi %c16_i32_12, %26 : i32
    %c8_i32_13 = arith.constant 8 : i32
    %28 = vector.broadcast %c8_i32_13 : i32 to vector<16x32xi32>
    %29 = arith.cmpi sge, %9, %28 : vector<16x32xi32>
    %c16_i32_14 = arith.constant 16 : i32
    %30 = vector.broadcast %c16_i32_14 : i32 to vector<16x32xi32>
    %31 = arith.cmpi slt, %9, %30 : vector<16x32xi32>
    %32 = arith.andi %29, %31 : vector<16x32xi1>
    %c16_i32_15 = arith.constant 16 : i32
    %33 = vector.broadcast %c16_i32_15 : i32 to vector<16x32xi32>
    %34 = arith.cmpi sge, %10, %33 : vector<16x32xi32>
    %35 = vector.broadcast %27 : i32 to vector<16x32xi32>
    %36 = arith.cmpi slt, %10, %35 : vector<16x32xi32>
    %37 = arith.andi %34, %36 : vector<16x32xi1>
    %38 = arith.andi %32, %37 : vector<16x32xi1>
    %39 = arith.ori %24, %38 : vector<16x32xi1>
    %cst_16 = arith.constant 0xFF800000 : f32
    %40 = vector.broadcast %cst_16 : f32 to vector<16x32xf32>
    %41 = arith.select %39, %8, %40 : vector<16x32xi1>, vector<16x32xf32>
    %cst_17 = arith.constant dense<0xFF800000> : vector<16xf32>
    %42 = vector.multi_reduction <maximumf>, %41, %cst_17 [1] : vector<16x32xf32> to vector<16xf32>
    %43 = vector.shape_cast %42 : vector<16xf32> to vector<16x1xf32>
    %44 = vector.broadcast %43 : vector<16x1xf32> to vector<16x32xf32>
    %45 = arith.subf %41, %44 : vector<16x32xf32>
    %46 = math.exp %45 : vector<16x32xf32>
    %cst_18 = arith.constant dense<0.000000e+00> : vector<16xf32>
    %47 = vector.multi_reduction <add>, %46, %cst_18 [1] : vector<16x32xf32> to vector<16xf32>
    %48 = vector.shape_cast %47 : vector<16xf32> to vector<16x1xf32>
    %49 = vector.broadcast %48 : vector<16x1xf32> to vector<16x32xf32>
    %50 = arith.divf %46, %49 : vector<16x32xf32>
    %cst_19 = arith.constant dense<0.000000e+00> : vector<16x32xf32>
    %51 = tpu.matmul %50, %6, %cst_19 {dimension_numbers = #tpu.dot_dimension_numbers<[1], [0], [0], [1], [0, 0, 1, 1], [], []>, precision = #tpu.contract_precision<fp32>} : vector<16x32xf32>, vector<32x32xf32>, vector<16x32xf32> -> vector<16x32xf32>
    %c0_20 = arith.constant 0 : index
    %c0_21 = arith.constant 0 : index
    %52 = vector.load %arg6[%c0_20, %c0_21] : memref<16x32xf32, #tpu.memory_space<vmem>>, vector<16x32xf32>
    tpu.vector_store %arg6[%c0_20, %c0_21], %51 {strides = array<i32>} : memref<16x32xf32, #tpu.memory_space<vmem>>, vector<16x32xf32>,
    %53 = vector.extract_strided_slice %50 {offsets = [0, 0], sizes = [8, 16], strides = [1, 1]} : vector<16x32xf32> to vector<8x16xf32>
    %c0_22 = arith.constant 0 : index
    %c0_23 = arith.constant 0 : index
    %54 = vector.load %arg7[%c0_22, %c0_23] : memref<16x16xf32, #tpu.memory_space<vmem>>, vector<8x16xf32>
    tpu.vector_store %arg7[%c0_22, %c0_23], %53 {strides = array<i32>} : memref<16x16xf32, #tpu.memory_space<vmem>>, vector<8x16xf32>,
    %55 = vector.extract_strided_slice %50 {offsets = [8, 16], sizes = [8, 16], strides = [1, 1]} : vector<16x32xf32> to vector<8x16xf32>
    %c8 = arith.constant 8 : index
    %c0_24 = arith.constant 0 : index
    %56 = vector.load %arg7[%c8, %c0_24] : memref<16x16xf32, #tpu.memory_space<vmem>>, vector<8x16xf32>
    tpu.vector_store %arg7[%c8, %c0_24], %55 {strides = array<i32>} : memref<16x16xf32, #tpu.memory_space<vmem>>, vector<8x16xf32>,
    return
  }
  func.func @transform_0(%arg0: i32, %arg1: memref<2xi32, #tpu.memory_space<smem>>) -> (i32, i32) {
    %c0_i32 = arith.constant 0 : i32
    %c0_i32_0 = arith.constant 0 : i32
    %c0_i32_1 = arith.constant 0 : i32
    return %c0_i32, %c0_i32_0 : i32, i32
  }
  func.func @transform_1(%arg0: i32, %arg1: memref<2xi32, #tpu.memory_space<smem>>) -> (i32, i32) {
    %c0_i32 = arith.constant 0 : i32
    %c0_i32_0 = arith.constant 0 : i32
    %c0_i32_1 = arith.constant 0 : i32
    return %c0_i32, %c0_i32_0 : i32, i32
  }
  func.func @transform_2(%arg0: i32, %arg1: memref<2xi32, #tpu.memory_space<smem>>) -> (i32, i32) {
    %c0_i32 = arith.constant 0 : i32
    %c0_i32_0 = arith.constant 0 : i32
    %c0_i32_1 = arith.constant 0 : i32
    return %c0_i32, %c0_i32_0 : i32, i32
  }
  func.func @transform_3(%arg0: i32, %arg1: memref<2xi32, #tpu.memory_space<smem>>) -> (i32, i32) {
    %c0_i32 = arith.constant 0 : i32
    %c0_i32_0 = arith.constant 0 : i32
    %c0_i32_1 = arith.constant 0 : i32
    return %c0_i32, %c0_i32_0 : i32, i32
  }
  func.func @transform_4(%arg0: i32, %arg1: memref<2xi32, #tpu.memory_space<smem>>) -> (i32, i32) {
    %c0_i32 = arith.constant 0 : i32
    %c0_i32_0 = arith.constant 0 : i32
    %c0_i32_1 = arith.constant 0 : i32
    return %c0_i32, %c0_i32_0 : i32, i32
  }
  func.func @transform_5(%arg0: i32, %arg1: memref<2xi32, #tpu.memory_space<smem>>) -> (i32, i32) {
    %c0_i32 = arith.constant 0 : i32
    %c0_i32_0 = arith.constant 0 : i32
    %c0_i32_1 = arith.constant 0 : i32
    return %c0_i32, %c0_i32_0 : i32, i32
  }
}

</mosaic_0001>

<bundles_post_ra>
// kernel: tpu_custom_call.1
= control target key start
LH: loop header
LB: loop body
LE: loop exit
PB: predicated region body
PF: predicated region fallthrough
CT: control target
= control target key end

     0   :  { %s2673_s0 = inlined_call_operand.hbm [shape: s32[2], index: 0, kind: input, shape index: {}]   ;;  %s2674_s1 = inlined_call_operand.hbm [shape: f32[16,32], index: 1, kind: input, shape index: {}]   ;;  %s2675_s2 = inlined_call_operand.hbm [shape: f32[32,32], index: 2, kind: input, shape index: {}]   ;;  %s2676_s3 = inlined_call_operand.hbm [shape: f32[32,32], index: 3, kind: input, shape index: {}]   ;;  %s2677_s4 = inlined_call_operand.vmem [shape: f32[1,32], index: 4, kind: input, shape index: {}]   ;;  %s2678_s5 = inlined_call_operand.hbm [shape: f32[16,32], index: 5, kind: output, shape index: {0}]   ;;  %s2679_s6 = inlined_call_operand.hbm [shape: f32[16,16], index: 6, kind: output, shape index: {1}]  }
   0x1   :  { %s2304_s23 = scalar_lea.hbm %s2673_s0, 16 }
   0x2   :  { %p2305_p0 = scmp.ne.s32.totalorder %s2673_s0, %s2304_s23  ;;  %p2308_p1 = scmp.lt.u32.totalorder %s2304_s23, %s2673_s0 }
   0x4   :  { %p2310_p2 = pnand %p2308_p1, %p2305_p0 }
   0x6   :  { %2313 = shalt.err (!%p2310_p2)  }
   0x7   :  { %s2434_s28 = smov [#allocation3]  }
   0x8   :  { %13 = dma.hbm_to_smem %s2673_s0, 16, %s2434_s28, [#allocation2] }
   0x9   :  { %2424 = dma.done.wait [#allocation2], 16 }
   0xa   :  { %2425 = vsyncadd [#allocation2], 4294967280 }
   0xb   :  { %15 = sfence }
   0xc   :  { %16 = vsyncpa [#allocation5], 0 }
   0xd   :  { %17 = vsyncpa [#allocation8], 0 }
   0xe   :  { %18 = vsyncpa [#allocation6], 0 }
   0xf   :  { %19 = vsyncpa [#allocation12], 0  ;;  %s2435_s7 = smov [#allocation7]   ;;  %s2436_s9 = smov [#allocation4]  }
  0x10   :  { %s37_s8 = sshll.u32 %s2435_s7, 4  ;;  %s25_s10 = sshll.u32 %s2436_s9, 4  ;;  %s38_s8 = int_to_ptr.vmem [resolvable:$true] %s37_s8  ;;  %s2490_s10 = int_to_ptr.vmem [resolvable:$true] %s25_s10 }
  0x11   :  { %s2314_s13 = scalar_lea.hbm %s2675_s2, 512 }
  0x12   :  { %p2315_p3 = scmp.ne.s32.totalorder %s2675_s2, %s2314_s13  ;;  %p2318_p4 = scmp.lt.u32.totalorder %s2314_s13, %s2675_s2 }
  0x14   :  { %p2320_p5 = pnand %p2318_p4, %p2315_p3 }
  0x16   :  { %2323 = shalt.err (!%p2320_p5)
}
  0x17   :  { %s2324_s17 = scalar_lea.vmem %s38_s8, 512  ;;  %p2329_p7 = scmp.lt.s32.totalorder %s38_s8, %s38_s8 }
  0x18   :  { %p2325_p6 = scmp.ne.s32.totalorder %s38_s8, %s2324_s17  ;;  %p2330_p8 = scmp.lt.s32.totalorder %s2324_s17, %s2324_s17 }
  0x1a   :  { %p2331_p9 = por %p2330_p8, %p2329_p7 }
  0x1c   :  { %p2332_p10 = pnand %p2331_p9, %p2325_p6 }
  0x1e   :  { %2335 = shalt.err (!%p2332_p10)
}
  0x1f   :  { %s2437_s18 = smov 128   ;;  %s2438_s19 = smov 8  }
  0x20   :  { %43 = dma.hbm_to_vmem [thread:$0]  %s2675_s2, 512, %s38_s8, [#allocation8], %s2437_s18, %s2437_s18, %s2438_s19  }
  0x21   :  { %s2336_s24 = scalar_lea.hbm %s2674_s1, 256 }
  0x22   :  { %p2337_p11 = scmp.ne.s32.totalorder %s2674_s1, %s2336_s24  ;;  %p2340_p12 = scmp.lt.u32.totalorder %s2336_s24, %s2674_s1 }
  0x24   :  { %p2342_p13 = pnand %p2340_p12, %p2337_p11 }
  0x26   :  { %2345 = shalt.err (!%p2342_p13)
}
  0x27   :  { %s2346_s29 = scalar_lea.vmem %s2490_s10, 256  ;;  %p2351_p1 = scmp.lt.s32.totalorder %s2490_s10, %s2490_s10 }
  0x28   :  { %p2347_p0 = scmp.ne.s32.totalorder %s2490_s10, %s2346_s29  ;;  %p2352_p2 = scmp.lt.s32.totalorder %s2346_s29, %s2346_s29 }
  0x2a   :  { %p2353_p3 = por %p2352_p2, %p2351_p1 }
  0x2c   :  { %p2354_p4 = pnand %p2353_p3, %p2347_p0 }
  0x2e   :  { %2357 = shalt.err (!%p2354_p4)
}
  0x2f   :  { %31 = dma.hbm_to_vmem [thread:$0]  %s2674_s1, 256, %s2490_s10, [#allocation5], %s2437_s18, %s2437_s18, %s2438_s19  }
  0x30   :  { %s2439_s7 = smov [#allocation9]   ;;  %s2358_s12 = scalar_lea.hbm %s2676_s3, 512 }
  0x31   :  { %s49_s8 = sshll.u32 %s2439_s7, 4  ;;  %p2359_p5 = scmp.ne.s32.totalorder %s2676_s3, %s2358_s12  ;;  %s50_s8 = int_to_ptr.vmem [resolvable:$true] %s49_s8 }
  0x32   :  { %p2362_p6 = scmp.lt.u32.totalorder %s2358_s12, %s2676_s3 }
  0x34   :  { %p2364_p7 = pnand %p2362_p6, %p2359_p5 }
  0x36   :  { %2367 = shalt.err (!%p2364_p7)
}
  0x37   :  { %s2368_s16 = scalar_lea.vmem %s50_s8, 512  ;;  %p2373_p9 = scmp.lt.s32.totalorder %s50_s8, %s50_s8 }
  0x38   :  { %p2369_p8 = scmp.ne.s32.totalorder %s50_s8, %s2368_s16  ;;  %p2374_p10 = scmp.lt.s32.totalorder %s2368_s16, %s2368_s16 }
  0x3a   :  { %p2375_p11 = por %p2374_p10, %p2373_p9 }
  0x3c   :  { %p2376_p12 = pnand %p2375_p11, %p2369_p8 }
  0x3e   :  { %2379 = shalt.err (!%p2376_p12)
}
  0x3f   :  { %55 = dma.hbm_to_vmem [thread:$0]  %s2676_s3, 512, %s50_s8, [#allocation8], %s2437_s18, %s2437_s18, %s2438_s19  }
  0x40   :  { %2426 = dma.done.wait [#allocation5], 256  }
  0x41   :  { %2427 = vsyncadd [#allocation5], 4294967040 }
  0x42   :  { %2428 = dma.done.wait [#allocation8], 1024  }
  0x43   :  { %2429 = vsyncadd [#allocation8], 4294966272  ;;  %vm80_vm0 = vcmask 261120   ;;  %v69_v0 = vld [vmem:[#allocation9] sm:$0xff]  ;;  %v70_v1 = vld [vmem:[#allocation9 + $0x8] sm:$0xff]  ;;  %s1170_s20 = sld [smem:[#allocation3]] }
  0x44   :  { %v71_v2 = vld [vmem:[#allocation9 + $0x10] sm:$0xff]  ;;  %v88_v3 = vand.u32 4294901760, %v69_v0  ;;  %v91_v4 = vand.u32 4294901760, %v70_v1  ;;  %v72_v5 = vld [vmem:[#allocation9 + $0x18] sm:$0xff]  ;;  %v2555_v23 = vld [vmem:[#allocation7] sm:$0xff]  ;;  %vm1763_vm5 = vcmask 130048  }
  0x45   :  { %v94_v6 = vand.u32 4294901760, %v71_v2  ;;  %v67_v7 = vld [vmem:[#allocation4] sm:$0xff]  ;;  %v68_v8 = vld [vmem:[#allocation4 + $0x8] sm:$0xff]  ;;  %v97_v9 = vand.u32 4294901760, %v72_v5  ;;  %v2559_v30 = vld [vmem:[#allocation7 + $0x8] sm:$0xff]  ;;  %v626_v34 = vsel %vm80_vm0, %v2555_v23, 0 }
  0x46   :  { %v82_v10 = vsel %vm80_vm0, %v67_v7, 0  ;;  %v85_v11 = vsel %vm80_vm0, %v68_v8, 0  ;;  %v2544_v12 = vpack.c.bf16 %v91_v4, %v88_v3  ;;  %v178_v15 = vsub.f32 %v69_v0, %v88_v3  ;;  %v2584_v53 = vld [vmem:[#allocation7 + $0x10] sm:$0xff]  ;;  %v2586_v54 = vld [vmem:[#allocation7 + $0x18] sm:$0xff]  ;;  %s2440_s22 = smov 112   ;;  %s2441_s23 = smov [#allocation11]  }
  0x47   :  { %v2546_v13 = vand.u32 4294901760, %v82_v10  ;;  %v2548_v14 = vand.u32 4294901760, %v85_v11  ;;  %v2550_v16 = vpack.c.bf16 %v97_v9, %v94_v6  ;;  %v185_v17 = vsub.f32 %v70_v1, %v91_v4  ;;  %s1786_s24 = sshll.u32 %s2441_s23, 4  ;;  %s1787_s24 = int_to_ptr.vmem [resolvable:$true] %s1786_s24 }
  0x48   :  { %v192_v18 = vsub.f32 %v71_v2, %v94_v6  ;;  %v199_v19 = vsub.f32 %v72_v5, %v97_v9  ;;  %2112 = vmatprep.subr.bf16.mxu0 %v2544_v12  ;;  %v179_v22 = vand.u32 4294901760, %v178_v15  ;;  %v629_v41 = vsel %vm80_vm0, %v2559_v30, 0  ;;  %s2380_s25 = scalar_lea.vmem %s1787_s24, 256  ;;  %p2385_p2 = scmp.lt.s32.totalorder %s1787_s24, %s1787_s24 }
  0x49   :  { %v157_v20 = vsub.f32 %v82_v10, %v2546_v13  ;;  %v167_v21 = vsub.f32 %v85_v11, %v2548_v14  ;;  %2114 = vmatpush3.bf16.msra.mxu0 %v2544_v12  ;;  %v186_v24 = vand.u32 4294901760, %v185_v17  ;;  %v638_v44 = vand.u32 4294901760, %v626_v34  ;;  %p1171_p0 = scmp.lt.s32.totalorder %s1170_s20, 16  ;;  %p2381_p1 = scmp.ne.s32.totalorder %s1787_s24, %s2380_s25 }
  0x4a   :  { %v193_v25 = vand.u32 4294901760, %v192_v18  ;;  %v200_v26 = vand.u32 4294901760, %v199_v19  ;;  %2116 = vmatprep.subr.bf16.mxu0 %v2550_v16  ;;  %v180_v29 = vsub.f32 %v178_v15, %v179_v22  ;;  %v641_v45 = vand.u32 4294901760, %v629_v41  ;;  %p2386_p3 = scmp.lt.s32.totalorder %s2380_s25, %s2380_s25 }
  0x4b   :  { %v158_v27 = vand.u32 4294901760, %v157_v20  ;;  %v168_v28 = vand.u32 4294901760, %v167_v21  ;;  %v187_v31 = vsub.f32 %v185_v17, %v186_v24  ;;  %v2127_v49 = vpack.c.bf16 %v185_v17, %v178_v15  ;;  %s2683_s20 = smov (!%p1171_p0, %s1170_s20), 16 }
  0x4c   :  { %v194_v32 = vsub.f32 %v192_v18, %v193_v25  ;;  %v201_v33 = vsub.f32 %v199_v19, %v200_v26  ;;  %v181_v37 = vand.u32 4294901760, %v180_v29  ;;  %v2566_v48 = vpack.c.bf16 %v641_v45, %v638_v44  ;;  %p2387_p4 = por %p2386_p3, %p2385_p2 }
  0x4d   :  { %v159_v35 = vsub.f32 %v157_v20, %v158_v27  ;;  %v169_v36 = vsub.f32 %v167_v21, %v168_v28  ;;  %2118 = vmatpush3.bf16.msra.mxu0 %v2550_v16  ;;  %v188_v38 = vand.u32 4294901760, %v187_v31  ;;  %v2131_v50 = vpack.c.bf16 %v199_v19, %v192_v18  ;;  %v1803_v18 = vld [vmem:[%s2677_s4] ss:$0 sm:$0xff]  ;;  %s1804_s4 = sld [smem:[#allocation3 + $0x1]] }
  0x4e   :  { %v195_v39 = vand.u32 4294901760, %v194_v32  ;;  %v202_v40 = vand.u32 4294901760, %v201_v33  ;;  %2160 = vmatprep.subr.bf16.mxu1 %v2566_v48  ;;  %v2143_v51 = vpack.c.bf16 %v186_v24, %v179_v22  ;;  %v2147_v52 = vpack.c.bf16 %v200_v26, %v193_v25  ;;  %p2388_p5 = pnand %p2387_p4, %p2381_p1 }
  0x4f   :  { %v160_v42 = vand.u32 4294901760, %v159_v35  ;;  %v170_v43 = vand.u32 4294901760, %v169_v36  ;;  %v2119_v46 = vpack.c.bf16 %v188_v38, %v181_v37  ;;  %2162 = vmatpush3.bf16.xpose.msra.mxu1 %v2566_v48  ;;  %v632_v55 = vsel %vm80_vm0, %v2584_v53, 0 }
  0x50   :  { %v2123_v47 = vpack.c.bf16 %v202_v40, %v195_v39  ;;  %v635_v56 = vsel %vm80_vm0, %v2586_v54, 0  ;;  %v644_v57 = vand.u32 4294901760, %v632_v55  ;;  %v728_v60 = vsub.f32 %v626_v34, %v638_v44 }
  0x51   :  { %1921 = vmatprep.mubr.f32.mxu0 %v160_v42  ;;  %2120 = vmatprep.subr.bf16.mxu0 %v2119_v46  ;;  %v647_v58 = vand.u32 4294901760, %v635_v56  ;;  %v735_v61 = vsub.f32 %v629_v41, %v641_v45  ;;  %v1168_v37 = vlaneseq  ;;  %v1180_v40 = vstv %s2683_s20 }
  0x52   :  { %1922 = vmatmul.mubr.f32.vlgmr.msra.gmra.mrb[0].mxu0 %v170_v43  ;;  %v729_v62 = vand.u32 4294901760, %v728_v60  ;;  %v742_v5 = vsub.f32 %v632_v55, %v644_v57 }
  0x53   :  { %2122 = vmatpush3.bf16.msra.mxu0 %v2119_v46  ;;  %1932 = vmatprep.mubr.f32.mxu0 %v2546_v13  ;;  %v2592_v59 = vpack.c.bf16 %v647_v58, %v644_v57  ;;  %v736_v63 = vand.u32 4294901760, %v735_v61  ;;  %v749_v6 = vsub.f32 %v635_v56, %v647_v58  ;;  %p1186_p13 = scmp.lt.s32.totalorder %s1804_s4, 16  ;;  %v1169_v38 = vand.u32 127, %v1168_v37 }
  0x54   :  { %2124 = vmatprep.subr.bf16.mxu0 %v2123_v47  ;;  %v730_v0 = vsub.f32 %v728_v60, %v729_v62  ;;  %v743_v7 = vand.u32 4294901760, %v742_v5 }
  0x55   :  { %2164 = vmatprep.subr.bf16.mxu1 %v2592_v59  ;;  %v737_v1 = vsub.f32 %v735_v61, %v736_v63  ;;  %v750_v8 = vand.u32 4294901760, %v749_v6  ;;  %v2179_v15 = vpack.c.bf16 %v749_v6, %v742_v5  ;;  %s2681_s4 = smov (!%p1186_p13, %s1804_s4), 16  ;;  %vm1195_vm1 = vcmp.ge.s32.totalorder %v1169_v38, 16 }
  0x56   :  { %v731_v2 = vand.u32 4294901760, %v730_v0  ;;  %v744_v9 = vsub.f32 %v742_v5, %v743_v7  ;;  %s1188_s21 = sadd.s32 16, %s2681_s4  ;;  %vm1181_vm3 = vcmp.lt.s32.totalorder %v1169_v38, %v1180_v40  ;;  %v1240_v0 = vand.u32 4294901760, %v2584_v53 }
  0x57   :  { %2126 = vmatpush3.bf16.msra.mxu0 %v2123_v47  ;;  %2166 = vmatpush3.bf16.xpose.msra.mxu1 %v2592_v59  ;;  %v738_v3 = vand.u32 4294901760, %v737_v1  ;;  %v751_v10 = vsub.f32 %v749_v6, %v750_v8  ;;  %v2195_v17 = vpack.c.bf16 %v750_v8, %v743_v7  ;;  %v1196_v39 = vstv %s1188_s21 }
  0x58   :  { %2128 = vmatprep.subr.bf16.mxu0 %v2127_v49  ;;  %v745_v11 = vand.u32 4294901760, %v744_v9  ;;  %vm1197_vm2 = vcmp.lt.s32.totalorder %v1169_v38, %v1196_v39  ;;  %v1243_v1 = vand.u32 4294901760, %v2586_v54  ;;  %v1338_v7 = vsub.f32 %v2584_v53, %v1240_v0 }
  0x59   :  { %v2167_v4 = vpack.c.bf16 %v738_v3, %v731_v2  ;;  %vm1198_vm4 = vmand %vm1195_vm1, %vm1197_vm2 }
  0x5a   :  { %1933 = vmatmul.mubr.f32.vlgmr.msra.gmra.mrb[0].mxu0 %v2548_v14  ;;  %v1339_v9 = vand.u32 4294901760, %v1338_v7 }
  0x5b   :  { %2130 = vmatpush3.bf16.msra.mxu0 %v2127_v49  ;;  %1943 = vmatprep.mubr.f32.mxu0 %v157_v20 }
  0x5c   :  { %2132 = vmatprep.subr.bf16.mxu0 %v2131_v50  ;;  %2168 = vmatprep.subr.bf16.mxu1 %v2167_v4 }
  0x5f   :  { %2134 = vmatpush3.bf16.msra.mxu0 %v2131_v50 }
  0x60   :  { %2136 = vmatprep.subr.bf16.mxu0 %v2544_v12 }
  0x62   :  { %1944 = vmatmul.mubr.f32.vlgmr.msra.gmra.mrb[0].mxu0 %v167_v21 }
  0x63   :  { %2138 = vmatpush3.bf16.msra.mxu0 %v2544_v12  ;;  %1954 = vmatprep.mubr.f32.mxu0 %v158_v27 }
  0x64   :  { %2140 = vmatprep.subr.bf16.mxu0 %v2550_v16 }
  0x67   :  { %2142 = vmatpush3.bf16.msra.mxu0 %v2550_v16 }
  0x68   :  { %2144 = vmatprep.subr.bf16.mxu0 %v2143_v51 }
  0x6a   :  { %1955 = vmatmul.mubr.f32.vlgmr.msra.gmra.mrb[0].mxu0 %v168_v28 }
  0x6b   :  { %2146 = vmatpush3.bf16.msra.mxu0 %v2143_v51  ;;  %1965 = vmatprep.mubr.f32.mxu0 %v2546_v13 }
  0x6c   :  { %2148 = vmatprep.subr.bf16.mxu0 %v2147_v52 }
  0x6f   :  { %2150 = vmatpush3.bf16.msra.mxu0 %v2147_v52 }
  0x70   :  { %2152 = vmatprep.subr.bf16.mxu0 %v2544_v12 }
  0x72   :  { %1966 = vmatmul.mubr.f32.vlgmr.msra.gmra.mrb[0].mxu0 %v2548_v14 }
  0x73   :  { %2154 = vmatpush3.bf16.msra.mxu0 %v2544_v12  ;;  %1976 = vmatprep.mubr.f32.mxu0 %v2546_v13  ;;  %v752_v12 = vand.u32 4294901760, %v751_v10 }
  0x74   :  { %2156 = vmatprep.subr.bf16.mxu0 %v2550_v16 }
  0x75   :  { %v2171_v13 = vpack.c.bf16 %v752_v12, %v745_v11  ;;  %v1340_v12 = vsub.f32 %v1338_v7, %v1339_v9 }
  0x77   :  { %2158 = vmatpush3.bf16.msra.mxu0 %v2550_v16  ;;  %v2191_v16 = vpack.c.bf16 %v736_v63, %v729_v62 }
  0x7a   :  { %1977 = vmatmul.mubr.f32.vlgmr.msra.gmra.mrb[0].mxu0 %v2548_v14  ;;  %v2175_v14 = vpack.c.bf16 %v735_v61, %v728_v60  ;;  %v1237_v60 = vand.u32 4294901760, %v2559_v30 }
  0x7c   :  { %v1331_v63 = vsub.f32 %v2559_v30, %v1237_v60 }
  0x7e   :  { %v1332_v3 = vand.u32 4294901760, %v1331_v63 }
  0x80   :  { %v1333_v6 = vsub.f32 %v1331_v63, %v1332_v3 }
  0x82   :  { %v1334_v8 = vand.u32 4294901760, %v1333_v6 }
 0x14d   :  { %v1978_v19 = vpop.f32.mrb[0].mxu0 }
 0x14e   :  { %v2255_v20 = vadd.f32 %v1978_v19, %v1803_v18  ;;  %v605_v21 = vpop.f32.mrb[1].mxu0 }
 0x14f   :  { %v2256_v22 = vadd.f32 %v1803_v18, %v605_v21 }
 0x150   :  { %v623_v24 = vsel %vm80_vm0, %v2255_v20, 0 }
 0x151   :  { %v716_v25 = vand.u32 4294901760, %v623_v24  ;;  %v620_v26 = vsel %vm80_vm0, %v2256_v22, 0 }
 0x152   :  { %v706_v27 = vand.u32 4294901760, %v620_v26 }
 0x153   :  { %v717_v28 = vsub.f32 %v623_v24, %v716_v25 }
 0x154   :  { %v707_v29 = vsub.f32 %v620_v26, %v706_v27 }
 0x155   :  { %v718_v31 = vand.u32 4294901760, %v717_v28 }
 0x156   :  { %v708_v32 = vand.u32 4294901760, %v707_v29 }
 0x157   :  { %v719_v33 = vsub.f32 %v717_v28, %v718_v31 }
 0x158   :  { %v709_v34 = vsub.f32 %v707_v29, %v708_v32 }
 0x159   :  { %v720_v36 = vand.u32 4294901760, %v719_v33 }
 0x15a   :  { %v710_v35 = vand.u32 4294901760, %v709_v34 }
 0x15c   :  { %1987 = vmatprep.mubr.f32.mxu1 %v710_v35 }
 0x15d   :  { %1988 = vmatmul.mubr.f32.vlgmr.msra.gmra.mrb[0].mxu1 %v720_v36 }
 0x15e   :  { %2170 = vmatpush3.bf16.xpose.msra.mxu1 %v2167_v4  ;;  %1998 = vmatprep.mubr.f32.mxu1 %v706_v27  ;;  %v2623_v4 = vpack.c.bf16 %v1243_v1, %v1240_v0 }
 0x15f   :  { %2172 = vmatprep.subr.bf16.mxu1 %v2171_v13 }
 0x166   :  { %2174 = vmatpush3.bf16.xpose.msra.mxu1 %v2171_v13 }
 0x167   :  { %2176 = vmatprep.subr.bf16.mxu1 %v2175_v14 }
 0x16d   :  { %1999 = vmatmul.mubr.f32.vlgmr.msra.gmra.mrb[0].mxu1 %v716_v25 }
 0x16e   :  { %2178 = vmatpush3.bf16.xpose.msra.mxu1 %v2175_v14  ;;  %2009 = vmatprep.mubr.f32.mxu1 %v707_v29  ;;  %v1341_v14 = vand.u32 4294901760, %v1340_v12 }
 0x16f   :  { %2180 = vmatprep.subr.bf16.mxu1 %v2179_v15 }
 0x176   :  { %2182 = vmatpush3.bf16.xpose.msra.mxu1 %v2179_v15 }
 0x177   :  { %2184 = vmatprep.subr.bf16.mxu1 %v2566_v48 }
 0x17d   :  { %2010 = vmatmul.mubr.f32.vlgmr.msra.gmra.mrb[0].mxu1 %v717_v28 }
 0x17e   :  { %2186 = vmatpush3.bf16.xpose.msra.mxu1 %v2566_v48  ;;  %2020 = vmatprep.mubr.f32.mxu1 %v708_v32 }
 0x17f   :  { %2188 = vmatprep.subr.bf16.mxu1 %v2592_v59 }
 0x186   :  { %2190 = vmatpush3.bf16.xpose.msra.mxu1 %v2592_v59 }
 0x187   :  { %2192 = vmatprep.subr.bf16.mxu1 %v2191_v16 }
 0x18d   :  { %2021 = vmatmul.mubr.f32.vlgmr.msra.gmra.mrb[0].mxu1 %v718_v31 }
 0x18e   :  { %2194 = vmatpush3.bf16.xpose.msra.mxu1 %v2191_v16  ;;  %2031 = vmatprep.mubr.f32.mxu1 %v706_v27 }
 0x18f   :  { %2196 = vmatprep.subr.bf16.mxu1 %v2195_v17 }
 0x196   :  { %2198 = vmatpush3.bf16.xpose.msra.mxu1 %v2195_v17 }
 0x197   :  { %2200 = vmatprep.subr.bf16.mxu1 %v2566_v48 }
 0x19d   :  { %2032 = vmatmul.mubr.f32.vlgmr.msra.gmra.mrb[0].mxu1 %v716_v25 }
 0x19e   :  { %2202 = vmatpush3.bf16.xpose.msra.mxu1 %v2566_v48  ;;  %2042 = vmatprep.mubr.f32.mxu1 %v706_v27 }
 0x19f   :  { %2204 = vmatprep.subr.bf16.mxu1 %v2592_v59 }
 0x1a6   :  { %2206 = vmatpush3.bf16.xpose.msra.mxu1 %v2592_v59  ;;  %v1234_v59 = vand.u32 4294901760, %v2555_v23 }
 0x1a8   :  { %v2615_v61 = vpack.c.bf16 %v1237_v60, %v1234_v59  ;;  %v1324_v62 = vsub.f32 %v2555_v23, %v1234_v59  ;;  %v1345_v23 = vsub.f32 %v2586_v54, %v1243_v1 }
 0x1aa   :  { %2208 = vmatprep.subr.bf16.mxu0 %v2615_v61  ;;  %v1325_v2 = vand.u32 4294901760, %v1324_v62  ;;  %v1346_v10 = vand.u32 4294901760, %v1345_v23  ;;  %v2223_v17 = vpack.c.bf16 %v1331_v63, %v1324_v62  ;;  %v2227_v18 = vpack.c.bf16 %v1345_v23, %v1338_v7 }
 0x1ab   :  { %2210 = vmatpush3.bf16.msra.mxu0 %v2615_v61 }
 0x1ac   :  { %v1326_v5 = vsub.f32 %v1324_v62, %v1325_v2  ;;  %2212 = vmatprep.subr.bf16.mxu0 %v2623_v4  ;;  %v1347_v13 = vsub.f32 %v1345_v23, %v1346_v10  ;;  %v2239_v53 = vpack.c.bf16 %v1332_v3, %v1325_v2  ;;  %v2243_v19 = vpack.c.bf16 %v1346_v10, %v1339_v9 }
 0x1ad   :  { %2043 = vmatmul.mubr.f32.vlgmr.msra.gmra.mrb[0].mxu1 %v716_v25 }
 0x1ae   :  { %v1327_v30 = vand.u32 4294901760, %v1326_v5  ;;  %v1348_v15 = vand.u32 4294901760, %v1347_v13 }
 0x1af   :  { %2214 = vmatpush3.bf16.msra.mxu0 %v2623_v4 }
 0x1b0   :  { %v2215_v11 = vpack.c.bf16 %v1334_v8, %v1327_v30  ;;  %v2219_v16 = vpack.c.bf16 %v1348_v15, %v1341_v14 }
 0x1b2   :  { %2216 = vmatprep.subr.bf16.mxu0 %v2215_v11 }
 0x280   :  { %v2044_v41 = vpop.f32.mrb[0].mxu1 }
 0x281   :  { %v1155_v42 = vpop.f32.mrb[1].mxu1  ;;  %v1204_v45 = vsel %vm1198_vm4, %v2044_v41, -inf }
 0x282   :  { %v1203_v43 = vsel %vm1181_vm3, %v1155_v42, -inf  ;;  %v1208_v46 = vsel %vm80_vm0, %v1204_v45, -inf }
 0x283   :  { %v1205_v44 = vsel %vm80_vm0, %v1203_v43, -inf }
 0x284   :  { %1206 = vmax.xlane.f32.xlu0 %v1205_v44 }
 0x288   :  { %1209 = vmax.xlane.f32.xlu0 %v1208_v46 }
 0x311   :  { %v1207_v47 = vpop.xlane.xlu0 %1206 }
 0x312   :  { %v1211_v48 = vsub.f32 %v1203_v43, %v1207_v47 }
 0x314   :  { %v1213_v49 = vmul.f32 1.442695, %v1211_v48 }
 0x315   :  { %v1210_v50 = vpop.xlane.xlu0 %1209 }
 0x316   :  { %2296 = vpow2.f32 %v1213_v49  ;;  %v1212_v51 = vsub.f32 %v1204_v45, %v1210_v50 }
 0x318   :  { %v1215_v52 = vmul.f32 1.442695, %v1212_v51 }
 0x31a   :  { %2298 = vpow2.f32 %v1215_v52 }
 0x320   :  { %v2297_v55 = vpop.eup %2296 }
 0x321   :  { %v1217_v56 = vsel %vm80_vm0, %v2297_v55, 0.0 }
 0x322   :  { %1218 = vadd.xlane.f32.xlu1 %v1217_v56 }
 0x324   :  { %v2299_v57 = vpop.eup %2298 }
 0x325   :  { %v1220_v58 = vsel %vm80_vm0, %v2299_v57, 0.0 }
 0x326   :  { %1221 = vadd.xlane.f32.xlu1 %v1220_v58 }
 0x3af   :  { %v1219_v54 = vpop.xlane.xlu1 %1218 }
 0x3b0   :  { %2300 = vrcp.f32 %v1219_v54 }
 0x3b3   :  { %v1222_v20 = vpop.xlane.xlu1 %1221 }
 0x3b4   :  { %2302 = vrcp.f32 %v1222_v20 }
 0x3ba   :  { %v2301_v21 = vpop.eup %2300 }
 0x3bb   :  { %v1224_v22 = vmul.f32 %v2301_v21, %v2297_v55 }
 0x3bd   :  { %v1228_v24 = vsel %vm80_vm0, %v1224_v22, 0  ;;  %1764 = vst.msk [vmem:[#allocation11] sm:$0xff] %vm1763_vm5, %v1224_v22 }
 0x3be   :  { %v2303_v25 = vpop.eup %2302  ;;  %v1302_v26 = vand.u32 4294901760, %v1228_v24 }
 0x3bf   :  { %v1226_v27 = vmul.f32 %v2303_v25, %v2299_v57 }
 0x3c0   :  { %v1303_v28 = vsub.f32 %v1228_v24, %v1302_v26 }
 0x3c1   :  { %1765 = vrot.lane.b32.xlu0 %v1226_v27, %s2440_s22  ;;  %v1231_v29 = vsel %vm80_vm0, %v1226_v27, 0 }
 0x3c2   :  { %v1312_v31 = vand.u32 4294901760, %v1231_v29  ;;  %v1304_v32 = vand.u32 4294901760, %v1303_v28 }
 0x3c4   :  { %v1313_v33 = vsub.f32 %v1231_v29, %v1312_v31  ;;  %v1305_v34 = vsub.f32 %v1303_v28, %v1304_v32 }
 0x3c6   :  { %v1306_v35 = vand.u32 4294901760, %v1305_v34  ;;  %v1314_v36 = vand.u32 4294901760, %v1313_v33 }
 0x3c8   :  { %2053 = vmatprep.mubr.f32.mxu0 %v1306_v35  ;;  %v1315_v37 = vsub.f32 %v1313_v33, %v1314_v36 }
 0x3ca   :  { %v1316_v38 = vand.u32 4294901760, %v1315_v37 }
 0x3cc   :  { %2054 = vmatmul.mubr.f32.vlgmr.msra.gmra.mrb[2].mxu0 %v1316_v38 }
 0x3cd   :  { %2218 = vmatpush3.bf16.msra.mxu0 %v2215_v11  ;;  %2064 = vmatprep.mubr.f32.mxu0 %v1302_v26 }
 0x3ce   :  { %2220 = vmatprep.subr.bf16.mxu0 %v2219_v16 }
 0x3d1   :  { %2222 = vmatpush3.bf16.msra.mxu0 %v2219_v16 }
 0x3d2   :  { %2224 = vmatprep.subr.bf16.mxu0 %v2223_v17 }
 0x3d4   :  { %2065 = vmatmul.mubr.f32.vlgmr.msra.gmra.mrb[2].mxu0 %v1312_v31 }
 0x3d5   :  { %2226 = vmatpush3.bf16.msra.mxu0 %v2223_v17  ;;  %2075 = vmatprep.mubr.f32.mxu0 %v1303_v28 }
 0x3d6   :  { %2228 = vmatprep.subr.bf16.mxu0 %v2227_v18 }
 0x3d9   :  { %2230 = vmatpush3.bf16.msra.mxu0 %v2227_v18 }
 0x3da   :  { %2232 = vmatprep.subr.bf16.mxu0 %v2615_v61 }
 0x3dc   :  { %2076 = vmatmul.mubr.f32.vlgmr.msra.gmra.mrb[2].mxu0 %v1313_v33 }
 0x3dd   :  { %2234 = vmatpush3.bf16.msra.mxu0 %v2615_v61  ;;  %2086 = vmatprep.mubr.f32.mxu0 %v1304_v32 }
 0x3de   :  { %2236 = vmatprep.subr.bf16.mxu0 %v2623_v4 }
 0x3e1   :  { %2238 = vmatpush3.bf16.msra.mxu0 %v2623_v4 }
 0x3e2   :  { %2240 = vmatprep.subr.bf16.mxu0 %v2239_v53 }
 0x3e4   :  { %2087 = vmatmul.mubr.f32.vlgmr.msra.gmra.mrb[2].mxu0 %v1314_v36 }
 0x3e5   :  { %2242 = vmatpush3.bf16.msra.mxu0 %v2239_v53  ;;  %2097 = vmatprep.mubr.f32.mxu0 %v1302_v26 }
 0x3e6   :  { %2244 = vmatprep.subr.bf16.mxu0 %v2243_v19 }
 0x3e9   :  { %2246 = vmatpush3.bf16.msra.mxu0 %v2243_v19 }
 0x3ea   :  { %2248 = vmatprep.subr.bf16.mxu0 %v2615_v61 }
 0x3ec   :  { %2098 = vmatmul.mubr.f32.vlgmr.msra.gmra.mrb[2].mxu0 %v1312_v31 }
 0x3ed   :  { %2250 = vmatpush3.bf16.msra.mxu0 %v2615_v61  ;;  %2108 = vmatprep.mubr.f32.mxu0 %v1302_v26 }
 0x3ee   :  { %2252 = vmatprep.subr.bf16.mxu0 %v2623_v4 }
 0x3f1   :  { %2254 = vmatpush3.bf16.msra.mxu0 %v2623_v4 }
 0x3f4   :  { %2109 = vmatmul.mubr.f32.vlgmr.msra.gmra.mrb[2].mxu0 %v1312_v31 }
 0x433   :  { %v1766_v39 = vpop.permute.xlu0 %1765 }
 0x434   :  { %1768 = vst.msk [vmem:[#allocation11 + $0x8] sm:$0xff] %vm1763_vm5, %v1766_v39 }
 0x435   :  { %2391 = shalt.err (!%p2388_p5)
}
 0x436   :  { %s2392_s28 = scalar_lea.hbm %s2679_s6, 256 }
 0x437   :  { %p2393_p6 = scmp.ne.s32.totalorder %s2679_s6, %s2392_s28  ;;  %p2396_p7 = scmp.lt.u32.totalorder %s2392_s28, %s2679_s6 }
 0x439   :  { %p2398_p8 = pnand %p2396_p7, %p2393_p6 }
 0x43b   :  { %2401 = shalt.err (!%p2398_p8)
}
 0x43c   :  { %1792 = dma.vmem_to_hbm [thread:$0]  %s1787_s24, 256, %s2679_s6, [#allocation12], %s2437_s18, %s2437_s18, %s2438_s19  }
 0x43d   :  { %s2442_s11 = smov [#allocation10]  }
 0x43e   :  { %s1774_s12 = sshll.u32 %s2442_s11, 4  ;;  %s1775_s12 = int_to_ptr.vmem [resolvable:$true] %s1774_s12 }
 0x43f   :  { %s2402_s13 = scalar_lea.vmem %s1775_s12, 256  ;;  %p2407_p10 = scmp.lt.s32.totalorder %s1775_s12, %s1775_s12 }
 0x440   :  { %p2403_p9 = scmp.ne.s32.totalorder %s1775_s12, %s2402_s13  ;;  %p2408_p11 = scmp.lt.s32.totalorder %s2402_s13, %s2402_s13 }
 0x442   :  { %p2409_p12 = por %p2408_p11, %p2407_p10 }
 0x444   :  { %p2410_p13 = pnand %p2409_p12, %p2403_p9 }
 0x4c7   :  { %v2110_v40 = vpop.f32.mrb[2].mxu0 }
 0x4c8   :  { %1762 = vst.msk [vmem:[#allocation10 + $0x8] sm:$0xff] %vm80_vm0, %v2110_v40  ;;  %v1751_v41 = vpop.f32.mrb[3].mxu0 }
 0x4c9   :  { %1761 = vst.msk [vmem:[#allocation10] sm:$0xff] %vm80_vm0, %v1751_v41 }
 0x4ca   :  { %2413 = shalt.err (!%p2410_p13)
}
 0x4cb   :  { %s2414_s6 = scalar_lea.hbm %s2678_s5, 256 }
 0x4cc   :  { %p2415_p0 = scmp.ne.s32.totalorder %s2678_s5, %s2414_s6  ;;  %p2418_p1 = scmp.lt.u32.totalorder %s2414_s6, %s2678_s5 }
 0x4ce   :  { %p2420_p2 = pnand %p2418_p1, %p2415_p0 }
 0x4d0   :  { %2423 = shalt.err (!%p2420_p2)
}
 0x4d1   :  { %1780 = dma.vmem_to_hbm [thread:$0]  %s1775_s12, 256, %s2678_s5, [#allocation6], %s2437_s18, %s2437_s18, %s2438_s19  }
 0x4d2   :  { %2430 = dma.done.wait [#allocation6], 256  }
 0x4d3   :  { %2431 = vsyncadd [#allocation6], 4294967040 }
 0x4d4   :  { %2432 = dma.done.wait [#allocation12], 256  }
 0x4d5   :  { %2433 = vsyncadd [#allocation12], 4294967040 }
 0x4d6   :  { %1799 = vsyncpa [#allocation5], 1 }
 0x4d7   :  { %1800 = vsyncpa [#allocation8], 1 }
 0x4d8   :  { %1801 = vsyncpa [#allocation6], 1 }
 0x4d9   :  { %1802 = vsyncpa [#allocation12], 1 }

</bundles_post_ra>
